<compile_context>
chip_gen: v7x
topology: tpu7x:2x2x1
jax: 0.10.0
libtpu: 0.0.40
codegen_flags: <defaults>
</compile_context>

<pallas_src>
import jax
import jax.numpy as jnp
from jax.experimental import pallas as pl
from jax.experimental.pallas import tpu as pltpu


def _head_kernel(x_ref, wqkv_ref, o_ref):
    # x_ref:    (Bb, T, C)   block of batch elements
    # wqkv_ref: (C, 3H)      fused projection weight [Wq | Wk | Wv], resident
    # o_ref:    (Bb, T, H)
    Bb, T, C = x_ref.shape
    H = o_ref.shape[-1]
    cdt = x_ref.dtype  # MXU operand dtype: bf16 inputs -> bf16 MXU path

    # Fold the 1/sqrt(H) scale into the query columns of the small (C, 3H) weight
    # (moves O(T^2) / O(T*H) VPU muls down to O(C*3H)).
    scale = H ** -0.5
    col = jax.lax.broadcasted_iota(jnp.int32, (1, 3 * H), 1)
    col_scale = jnp.where(col < H, jnp.float32(scale), jnp.float32(1.0))
    w_fused = (wqkv_ref[...].astype(jnp.float32) * col_scale).astype(cdt)

    # Fused QKV projection.  Flatten batch into MXU rows only when the reshape is a
    # pure view (T multiple of the sublane pack), otherwise project per batch
    # element to avoid a materialized VMEM copy of the x block.
    pack = 8 * 4 // x_ref.dtype.itemsize  # 8 for f32, 16 for bf16
    if T % pack == 0:
        x2 = x_ref[...].reshape(Bb * T, C)
        qkv = jnp.dot(x2, w_fused,
                      preferred_element_type=jnp.float32).reshape(Bb, T, 3 * H)
    else:
        qkv = jnp.stack(
            [jnp.dot(x_ref[b], w_fused, preferred_element_type=jnp.float32)
             for b in range(Bb)], axis=0)

    q = qkv[..., :H]
    k = qkv[..., H:2 * H]
    v = qkv[..., 2 * H:]

    # Affinity: contract on h (no explicit transpose of k).  (Bb, T, T), f32 acc.
    s = jnp.einsum('bqh,bkh->bqk', q.astype(cdt), k.astype(cdt),
                   preferred_element_type=jnp.float32)

    # Causal mask as a single 2-D additive 0/-inf bias, broadcast over batch.
    rows = jax.lax.broadcasted_iota(jnp.int32, (T, T), 0)
    cols = jax.lax.broadcasted_iota(jnp.int32, (T, T), 1)
    bias = jnp.where(rows >= cols, jnp.float32(0.0), -jnp.inf)
    s = s + bias[None, :, :]

    # Numerically stable softmax in f32; the diagonal is always unmasked so the row
    # max is finite.  Normalization is deferred past the PV matmul.
    m = jnp.max(s, axis=-1, keepdims=True)
    p = jnp.exp(s - m)
    denom = jnp.sum(p, axis=-1, keepdims=True)          # (Bb, T, 1)

    # Dropout: eval-mode identity.

    out = jnp.einsum('bqk,bkh->bqh', p.astype(cdt), v.astype(cdt),
                     preferred_element_type=jnp.float32)
    out = out * pl.reciprocal(denom, approx=True)        # O(Bb*T*H) scaling
    o_ref[...] = out.astype(o_ref.dtype)


def head_forward(x, wk, wq, wv, *, batch_block=None,
                 vmem_cap_bytes=48 * 1024 * 1024):
    """x: (B, T, C); wk/wq/wv: (C, H). Returns (B, T, H).

    batch_block: batch elements per grid step.  Default ceil(B/2) capped at 8 so the
    'parallel' grid axis has >= 2 steps (feeds both v7x TensorCores), shrunk until
    the per-block VMEM estimate fits under vmem_cap_bytes.
    """
    B, T, C = x.shape
    H = wk.shape[1]
    wqkv = jnp.concatenate([wq, wk, wv], axis=-1).astype(x.dtype)  # (C, 3H)

    it = jnp.dtype(x.dtype).itemsize

    def est_bytes(bb):
        # double-buffered x + weight + output, plus f32 scores/probs + qkv temps.
        return (2 * bb * T * C * it + 2 * C * 3 * H * it + 2 * bb * T * H * it
                + 2 * bb * T * T * 4 + bb * T * 3 * H * 4)

    if batch_block is None:
        batch_block = max(1, min(8, pl.cdiv(B, 2)))
        while batch_block > 1 and est_bytes(batch_block) > vmem_cap_bytes:
            batch_block = pl.cdiv(batch_block, 2)
    grid = (pl.cdiv(B, batch_block),)
    vmem_limit = int(min(max(2 * est_bytes(batch_block), 32 * 1024 * 1024),
                         vmem_cap_bytes))

    return pl.pallas_call(
        _head_kernel,
        out_shape=jax.ShapeDtypeStruct((B, T, H), x.dtype),
        grid_spec=pltpu.PrefetchScalarGridSpec(
            num_scalar_prefetch=0,
            grid=grid,
            in_specs=[
                pl.BlockSpec((batch_block, T, C), lambda b: (b, 0, 0)),
                pl.BlockSpec((C, 3 * H), lambda b: (0, 0)),
            ],
            out_specs=pl.BlockSpec((batch_block, T, H), lambda b: (b, 0, 0)),
        ),
        compiler_params=pltpu.CompilerParams(
            dimension_semantics=("parallel",),
            vmem_limit_bytes=vmem_limit),
    )(x, wqkv)


def head_reference(x, wk, wq, wv):
    """Pure-JAX reference matching the PyTorch forward (eval mode), f32."""
    x = x.astype(jnp.float32)
    wk, wq, wv = (w.astype(jnp.float32) for w in (wk, wq, wv))
    k = x @ wk
    q = x @ wq
    v = x @ wv
    aff = (q @ jnp.swapaxes(k, -2, -1)) * (k.shape[-1] ** -0.5)
    T = x.shape[1]
    tril = jnp.tril(jnp.ones((T, T), dtype=bool))
    aff = jnp.where(tril, aff, -jnp.inf)
    aff = jax.nn.softmax(aff, axis=-1)
    return aff @ v


if __name__ == "__main__":
    # batch=2, seq(block_size)=8, n_embed=32, head_size=16
    B, T, C, H = 2, 8, 32, 16
    key = jax.random.PRNGKey(0)
    kx, kk, kq, kv = jax.random.split(key, 4)

    x = jax.random.normal(kx, (B, T, C), dtype=jnp.float32)
    # deterministic "Linear" weights (stored as (C, H) = weight.T)
    wk = jax.random.normal(kk, (C, H), dtype=jnp.float32) * (C ** -0.5)
    wq = jax.random.normal(kq, (C, H), dtype=jnp.float32) * (C ** -0.5)
    wv = jax.random.normal(kv, (C, H), dtype=jnp.float32) * (C ** -0.5)

    ref = head_reference(x, wk, wq, wv)

    # f32 path (T=8 is a multiple of the f32 sublane pack -> flattened MXU path).
    out = jax.block_until_ready(head_forward(x, wk, wq, wv))
    assert out.shape == (B, T, H)
    assert jnp.allclose(out, ref, atol=2e-2, rtol=2e-2), "f32 mismatch vs reference"

    # bf16 MXU-operand path (v6e/v7x-friendly): same kernel, bf16 inputs/weights
    # (T=8 < bf16 pack of 16 -> exercises the per-batch projection fallback).
    out_bf16 = jax.block_until_ready(
        head_forward(x.astype(jnp.bfloat16), wk.astype(jnp.bfloat16),
                     wq.astype(jnp.bfloat16), wv.astype(jnp.bfloat16)))
    assert out_bf16.shape == (B, T, H)
    assert jnp.allclose(out_bf16.astype(jnp.float32), ref, atol=1e-1, rtol=1e-1), \
        "bf16 mismatch vs reference"

    print("KERNEL_OK")
</pallas_src>

<mosaic_0001>
module attributes {stable_mosaic.version = 11 : i64} {
  func.func @_head_kernel(%arg0: i32, %arg1: memref<1x8x32xf32, #tpu.memory_space<vmem>>, %arg2: memref<32x48xf32, #tpu.memory_space<vmem>>, %arg3: memref<1x8x16xf32, #tpu.memory_space<vmem>>) attributes {dimension_semantics = [#tpu.dimension_semantics<parallel>], iteration_bounds = array<i64: 2>, scalar_prefetch = 0 : i64, scratch_operands = 0 : i64, tpu.core_type = #tpu.core_type<tc>, window_params = [{transform_indices = @transform_0, window_bounds = array<i64: 1, 8, 32>}, {pipeline_mode = #tpu.pipeline_mode<synchronous>, transform_indices = @transform_1, window_bounds = array<i64: 32, 48>}, {transform_indices = @transform_2, window_bounds = array<i64: 1, 8, 16>}]} {
    %0 = tpu.iota {dimensions = array<i32: 1>} : vector<1x48xi32>
    %c16_i32 = arith.constant 16 : i32
    %1 = vector.broadcast %c16_i32 : i32 to vector<1x48xi32>
    %2 = arith.cmpi slt, %0, %1 : vector<1x48xi32>
    %cst = arith.constant 2.500000e-01 : f32
    %cst_0 = arith.constant 1.000000e+00 : f32
    %3 = vector.broadcast %cst : f32 to vector<1x48xf32>
    %4 = vector.broadcast %cst_0 : f32 to vector<1x48xf32>
    %5 = arith.select %2, %3, %4 : vector<1x48xi1>, vector<1x48xf32>
    %c0 = arith.constant 0 : index
    %c0_1 = arith.constant 0 : index
    %6 = vector.load %arg2[%c0, %c0_1] : memref<32x48xf32, #tpu.memory_space<vmem>>, vector<32x48xf32>
    %7 = vector.broadcast %5 : vector<1x48xf32> to vector<32x48xf32>
    %8 = arith.mulf %6, %7 : vector<32x48xf32>
    %c0_2 = arith.constant 0 : index
    %c0_3 = arith.constant 0 : index
    %c0_4 = arith.constant 0 : index
    %9 = vector.load %arg1[%c0_2, %c0_3, %c0_4] : memref<1x8x32xf32, #tpu.memory_space<vmem>>, vector<1x8x32xf32>
    %10 = vector.shape_cast %9 : vector<1x8x32xf32> to vector<8x32xf32>
    %cst_5 = arith.constant dense<0.000000e+00> : vector<8x48xf32>
    %11 = tpu.matmul %10, %8, %cst_5 {dimension_numbers = #tpu.dot_dimension_numbers<[1], [0], [0], [1], [0, 0, 1, 1], [], []>} : vector<8x32xf32>, vector<32x48xf32>, vector<8x48xf32> -> vector<8x48xf32>
    %12 = vector.shape_cast %11 : vector<8x48xf32> to vector<1x8x48xf32>
    %13 = vector.extract_strided_slice %12 {offsets = [0, 0, 0], sizes = [1, 8, 16], strides = [1, 1, 1]} : vector<1x8x48xf32> to vector<1x8x16xf32>
    %14 = vector.extract_strided_slice %12 {offsets = [0, 0, 16], sizes = [1, 8, 16], strides = [1, 1, 1]} : vector<1x8x48xf32> to vector<1x8x16xf32>
    %15 = vector.extract_strided_slice %12 {offsets = [0, 0, 32], sizes = [1, 8, 16], strides = [1, 1, 1]} : vector<1x8x48xf32> to vector<1x8x16xf32>
    "tpu.trace_start"() <{level = 10 : i32, message = "bqh,bkh->bqk"}> : () -> ()
    %cst_6 = arith.constant dense<0.000000e+00> : vector<1x8x8xf32>
    %16 = tpu.matmul %13, %14, %cst_6 {dimension_numbers = #tpu.dot_dimension_numbers<[2], [2], [1], [1], [0, 0, 0, 1, 1, 1], [0], [0]>} : vector<1x8x16xf32>, vector<1x8x16xf32>, vector<1x8x8xf32> -> vector<1x8x8xf32>
    "tpu.trace_stop"() : () -> ()
    %17 = tpu.iota {dimensions = array<i32: 0>} : vector<8x8xi32>
    %18 = tpu.iota {dimensions = array<i32: 1>} : vector<8x8xi32>
    %19 = arith.cmpi sge, %17, %18 : vector<8x8xi32>
    %cst_7 = arith.constant 0.000000e+00 : f32
    %cst_8 = arith.constant 0xFF800000 : f32
    %20 = vector.broadcast %cst_7 : f32 to vector<8x8xf32>
    %21 = vector.broadcast %cst_8 : f32 to vector<8x8xf32>
    %22 = arith.select %19, %20, %21 : vector<8x8xi1>, vector<8x8xf32>
    %23 = vector.shape_cast %22 : vector<8x8xf32> to vector<1x8x8xf32>
    %24 = arith.addf %16, %23 : vector<1x8x8xf32>
    %cst_9 = arith.constant dense<0xFF800000> : vector<1x8xf32>
    %25 = vector.multi_reduction <maximumf>, %24, %cst_9 [2] : vector<1x8x8xf32> to vector<1x8xf32>
    %26 = vector.shape_cast %25 : vector<1x8xf32> to vector<1x8x1xf32>
    %27 = vector.broadcast %26 : vector<1x8x1xf32> to vector<1x8x8xf32>
    %28 = arith.subf %24, %27 : vector<1x8x8xf32>
    %29 = math.exp %28 : vector<1x8x8xf32>
    %cst_10 = arith.constant dense<0.000000e+00> : vector<1x8xf32>
    %30 = vector.multi_reduction <add>, %29, %cst_10 [2] : vector<1x8x8xf32> to vector<1x8xf32>
    %31 = vector.shape_cast %30 : vector<1x8xf32> to vector<1x8x1xf32>
    "tpu.trace_start"() <{level = 10 : i32, message = "bqk,bkh->bqh"}> : () -> ()
    %cst_11 = arith.constant dense<0.000000e+00> : vector<1x8x16xf32>
    %32 = tpu.matmul %29, %15, %cst_11 {dimension_numbers = #tpu.dot_dimension_numbers<[2], [1], [1], [2], [0, 0, 0, 1, 1, 2], [0], [0]>} : vector<1x8x8xf32>, vector<1x8x16xf32>, vector<1x8x16xf32> -> vector<1x8x16xf32>
    "tpu.trace_stop"() : () -> ()
    %33 = tpu.reciprocal %31 {approx = true} : vector<1x8x1xf32> -> vector<1x8x1xf32>
    %34 = vector.broadcast %33 : vector<1x8x1xf32> to vector<1x8x16xf32>
    %35 = arith.mulf %32, %34 : vector<1x8x16xf32>
    %c0_12 = arith.constant 0 : index
    %c0_13 = arith.constant 0 : index
    %c0_14 = arith.constant 0 : index
    %36 = vector.load %arg3[%c0_12, %c0_13, %c0_14] : memref<1x8x16xf32, #tpu.memory_space<vmem>>, vector<1x8x16xf32>
    tpu.vector_store %arg3[%c0_12, %c0_13, %c0_14], %35 {strides = array<i32>} : memref<1x8x16xf32, #tpu.memory_space<vmem>>, vector<1x8x16xf32>,
    return
  }
  func.func @transform_0(%arg0: i32) -> (i32, i32, i32) {
    %c0_i32 = arith.constant 0 : i32
    %c0_i32_0 = arith.constant 0 : i32
    %c0_i32_1 = arith.constant 0 : i32
    return %arg0, %c0_i32, %c0_i32_0 : i32, i32, i32
  }
  func.func @transform_1(%arg0: i32) -> (i32, i32) {
    %c0_i32 = arith.constant 0 : i32
    %c0_i32_0 = arith.constant 0 : i32
    %c0_i32_1 = arith.constant 0 : i32
    return %c0_i32, %c0_i32_0 : i32, i32
  }
  func.func @transform_2(%arg0: i32) -> (i32, i32, i32) {
    %c0_i32 = arith.constant 0 : i32
    %c0_i32_0 = arith.constant 0 : i32
    %c0_i32_1 = arith.constant 0 : i32
    return %arg0, %c0_i32, %c0_i32_0 : i32, i32, i32
  }
}

</mosaic_0001>

<bundles_post_ra>
// kernel: tpu_custom_call.1
= control target key start
LH: loop header
LB: loop body
LE: loop exit
PB: predicated region body
PF: predicated region fallthrough
CT: control target
= control target key end

     0   :  { %7 = vsyncpa [#allocation3], 0  ;;  %s1013_s0 = inlined_call_operand.hbm [shape: f32[2,8,32], index: 0, kind: input, shape index: {}]   ;;  %s1014_s1 = inlined_call_operand.hbm [shape: f32[32,48], index: 1, kind: input, shape index: {}]   ;;  %s1015_s2 = inlined_call_operand.hbm [shape: f32[2,8,16], index: 2, kind: output, shape index: {}]  }
   0x1   :  { %9 = vsyncpa [#allocation3 + $0x1], 0 }
   0x2   :  { %10 = vsyncpa [#allocation6], 0 }
   0x3   :  { %11 = vsyncpa [#allocation4], 0 }
   0x4   :  { %13 = vsyncpa [#allocation4 + $0x1], 0  ;;  %s807_s9 = smov 0   ;;  %s809_s10 = smov 0  }
   0x5   :  { %s811_s11 = smov 0   ;;  %s813_s12 = smov 0  }
   0x6 LB: > { %s828_s13 = sadd.s32 4294967295, %s778_s12   ;;  %s526_s14 = sadd.s32 4294967294, %s778_s12   ;;  %s778_s12 = sphi %s813_s12, %s1035_s12   ;;  %s774_s11 = sphi %s811_s11, %s1034_s11   ;;  %s770_s10 = sphi %s809_s10, %s1033_s10   ;;  %s766_s9 = sphi %s807_s9, %s1032_s9  }
   0x7   : > { %p39_p0 = scmp.ne.s32.totalorder %s770_s10, %s766_s9  ;;  %p1016_p1 = scmp.eq.s32.totalorder %s828_s13, 0 }
   0x8   : > { %p90_p3 = scmp.eq.s32.totalorder %s526_s14, 1  ;;  %p527_p5 = scmp.ge.s32.totalorder %s778_s12, 1 }
   0x9   : > { %p837_p4 = por %p1016_p1, %p39_p0  ;;  %p97_p7 = scmp.lt.s32.totalorder %s778_s12, 3 }
   0xa   : > { %p842_p6 = por %p90_p3, %p39_p0  ;;  %s780_s18 = smov [#allocation5]  }
   0xb   : > { %s1019_s15 = scalar_select %p837_p4, 1, 0 }
   0xc   : > { %s1020_s16 = scalar_select %p842_p6, 1, 0 }
   0xd   : > { %p847_p8 = pnand %p527_p5, %p97_p7  ;;  %s109_s19 = sshll.u32 %s780_s18, 4  ;;  %s851_s19 = int_to_ptr.vmem [resolvable:$true] %s109_s19 }
   0xe   : > { %s863_s21 = sadd.s32 1, %s778_s12   ;;  %s26_s22 = sadd.s32 1, %s774_s11 }
   0xf   : > { %s1021_s17 = scalar_select %p847_p8, 1, 0 }
  0x10   : > { %p588_p9 = pneg %p847_p8  ;;  %s23_s23 = ssub.s32 %s778_s12, %s863_s21 }
  0x11   : > { %s650_s26 = scalar_lea.hbm %s1014_s1, 512 }
  0x12   : > { %p858_p11 = pnand %p588_p9, %p1016_p1  ;;  %p651_p12 = scmp.ne.s32.totalorder %s1014_s1, %s650_s26 }
  0x13   : > { %p657_p5 = scmp.lt.u32.totalorder %s650_s26, %s1014_s1 }
  0x14   : > { %p652_p13 = pneg %p858_p11 }
  0x16   : > { %p653_p0 = pnand %p652_p13, %p651_p12 }
  0x18   : > { %p654_p3 = pneg %p653_p0 }
  0x1a   : > { %p659_p7 = pnand %p657_p5, %p654_p3 }
  0x1c   : > { %662 = shalt.err (!%p659_p7)
}
  0x1d   : > { %s663_s3 = scalar_lea.vmem %s851_s19, 512  ;;  %p671_p2 = scmp.lt.s32.totalorder %s851_s19, %s851_s19 }
  0x1e   : > { %p664_p9 = scmp.ne.s32.totalorder %s851_s19, %s663_s3  ;;  %p672_p6 = scmp.lt.s32.totalorder %s663_s3, %s663_s3 }
  0x20   : > { %p666_p10 = pnand %p664_p9, %p652_p13  ;;  %p673_p4 = por %p672_p6, %p671_p2 }
  0x22   : > { %p667_p1 = pneg %p666_p10 }
  0x24   : > { %p674_p8 = pnand %p673_p4, %p667_p1 }
  0x26   : > { %677 = shalt.err (!%p674_p8)
}
  0x27   : > { %s781_s4 = smov 128   ;;  %s782_s5 = smov 8  }
  0x28   : > { %591 = dma.hbm_to_vmem [thread:$0]  (!%p858_p11), %s1014_s1, 512, %s851_s19, [#allocation6], %s781_s4, %s781_s4, %s782_s5  }
  0x29   : > { %p24_p2 = scmp.eq.s32.totalorder %s23_s23, 0  ;;  %p33_p1 = scmp.ne.s32.totalorder %s774_s11, %s770_s10 }
  0x2a   : > { %p34_p4 = scmp.eq.s32.totalorder %s778_s12, 0  ;;  %p601_p6 = scmp.lt.s32.totalorder %s778_s12, 2 }
  0x2b   : > { %s894_s8 = scalar_select %p24_p2, %s774_s11, %s26_s22  }
  0x2c   : > { %p35_p8 = por %p34_p4, %p33_p1  ;;  %p1023_p10 = scmp.eq.s32.totalorder %s828_s13, 1 }
  0x2d   : > { %s123_s18 = sand.u32 1, %s774_s11   ;;  %s531_s24 = sshll.u32 %s778_s12, 7 }
  0x2e   : > { %p898_p12 = por %p1023_p10, %p33_p1  ;;  %s530_s25 = sshll.u32 %s123_s18, 3 }
  0x2f   : > { %s907_s27 = scalar_lea.hbm %s1013_s0, %s531_s24  ;;  %s127_s19 = scalar_lea.vmem [#allocation2], %s530_s25 }
  0x30   : > { %s134_s22 = sshll.u32 %s127_s19, 4  ;;  %p909_p11 = pnand %p601_p6, %p35_p8  ;;  %s913_s22 = int_to_ptr.vmem [resolvable:$true] %s134_s22 }
  0x31   : > { %s124_s28 = scalar_lea.sflag [#allocation3], %s123_s18  ;;  %s678_s29 = scalar_lea.hbm %s907_s27, 128 }
  0x32   : > { %p679_p13 = scmp.ne.s32.totalorder %s907_s27, %s678_s29  ;;  %p680_p0 = pneg %p909_p11 }
  0x33   : > { %s683_s4 = scalar_lea.hbm %s1013_s0, 256  ;;  %p684_p7 = scmp.lt.u32.totalorder %s907_s27, %s1013_s0 }
  0x34   : > { %p681_p3 = pnand %p680_p0, %p679_p13  ;;  %p685_p9 = scmp.lt.u32.totalorder %s683_s4, %s678_s29 }
  0x35   : > { %p687_p1 = scmp.lt.u32.totalorder %s678_s29, %s907_s27 }
  0x36   : > { %p682_p5 = pneg %p681_p3  ;;  %p686_p2 = por %p685_p9, %p684_p7 }
  0x38   : > { %p688_p4 = por %p687_p1, %p686_p2 }
  0x3a   : > { %p689_p6 = pnand %p688_p4, %p682_p5 }
  0x3c   : > { %692 = shalt.err (!%p689_p6)
}
  0x3d   : > { %s693_s7 = scalar_lea.vmem %s913_s22, 128  ;;  %s783_s18 = smov [#allocation2]  }
  0x3e   : > { %p694_p8 = scmp.ne.s32.totalorder %s913_s22, %s693_s7  ;;  %s698_s24 = sshll.u32 %s783_s18, 4  ;;  %s699_s24 = int_to_ptr.vmem [resolvable:$false] %s698_s24 }
  0x3f   : > { %s700_s25 = scalar_lea.vmem %s699_s24, 256  ;;  %p701_p3 = scmp.lt.s32.totalorder %s913_s22, %s699_s24 }
  0x40   : > { %p696_p10 = pnand %p694_p8, %p680_p0  ;;  %p702_p7 = scmp.lt.s32.totalorder %s700_s25, %s693_s7 }
  0x42   : > { %p697_p13 = pneg %p696_p10  ;;  %p703_p9 = por %p702_p7, %p701_p3 }
  0x44   : > { %p704_p2 = pnand %p703_p9, %p697_p13 }
  0x46   : > { %707 = shalt.err (!%p704_p2)
}
  0x47   : > { %595 = dma.hbm_to_vmem [thread:$0]  (!%p909_p11), %s907_s27, 128, %s913_s22, %s124_s28  }
  0x48   : > { %p1026_p5 = scmp.ne.s32.totalorder %s1021_s17, 0 }
  0x49   : > { %s943_s20 = sand.u32 (!%p1026_p5), 1, %s770_s10   ;;  %p1027_p0 = scmp.ne.s32.totalorder (!%p1026_p5), %s1019_s15, 0 }
  0x4a   : > { %143 = sbr.rel (%p1026_p5) target bundleno = 1032 (0x408), region = 28  ;;  %s533_s26 = sshll.u32 (!%p1026_p5), %s943_s20, 3 }
  0x4b   : > { %s146_s19 = scalar_lea.sflag (!%p1026_p5), [#allocation3], %s943_s20  ;;  %s149_s29 = scalar_lea.vmem (!%p1026_p5), [#allocation2], %s533_s26 }
  0x51   : > { %753 = dma.done.wait (%p1027_p0), %s146_s19, 128  }
  0x52   : > { %755 = vsyncadd (%p1027_p0), %s146_s19, 4294967168  ;;  %p1028_p11 = scmp.eq.s32.totalorder %s828_s13, 0 }
  0x54   : > { %757 = dma.done.wait (%p1028_p11), [#allocation6], 512   ;;  %p1029_p1 = pmov %p1028_p11 }
  0x55   : > { %v174_v0 = vlaneseq  ;;  %v784_v1 = vmov 0.0|0.0   ;;  %vm785_vm0 = vmmov 0   ;;  %v786_v3 = vmov 0.0   ;;  %v178_v6 = vld [vmem:[#allocation5] sm:$0xff]  ;;  %v179_v7 = vld [vmem:[#allocation5 + $0x8] sm:$0xff]  ;;  %v180_v8 = vld [vmem:[#allocation5 + $0x10] sm:$0xff] }
  0x56   : > { %759 = vsyncadd (%p1029_p1), [#allocation6], 4294966784  ;;  %574 = vmatprep.subr.bf16.mxu0 %v784_v1  ;;  %561 = vmatprep.mubr.msk.f32.mxu0 %vm785_vm0, %v786_v3  ;;  %v787_v4 = vmov 1.0   ;;  %v181_v11 = vld [vmem:[#allocation5 + $0x18] sm:$0xff]  ;;  %vm187_vm2 = vcmask 261120   ;;  %s788_s15 = smov 96  }
  0x57   : > { %v175_v2 = vand.u32 127, %v174_v0  ;;  %564 = vmatprep.subr.mxu1 %v786_v3  ;;  %566 = vmatprep.mubr.msk.f32.mxu1 %vm785_vm0, %v786_v3  ;;  %v186_v16 = vld [vmem:[%s149_s29] sm:$0xff]  ;;  %s789_s17 = smov 112   ;;  %vm268_vm3 = vcmask 130048   ;;  %v262_v21 = vshrl.u32 %v174_v0, 7  ;;  %v790_v22 = vmov -inf  }
  0x58   : > { %vm343_vm5 = vcmask 64512   ;;  %s541_s27 = sshll.u32 %s828_s13, 7  ;;  %s173_s22 = scalar_lea.vmem [#allocation7], %s533_s26 }
  0x59   : > { %vm176_vm1 = vcmp.lt.s32.totalorder %v175_v2, 16  ;;  %vm263_vm4 = vcmp.ge.s32.totalorder %v262_v21, %v175_v2  ;;  %s446_s23 = sshll.u32 %s173_s22, 4  ;;  %s968_s3 = scalar_lea.hbm %s1015_s2, %s541_s27  ;;  %s970_s23 = int_to_ptr.vmem [resolvable:$true] %s446_s23 }
  0x5a   : > { %v177_v5 = vsel %vm176_vm1, 0.25, %v787_v4  ;;  %v264_v23 = vsel %vm263_vm4, 0.0, %v790_v22  ;;  %s433_s13 = scalar_lea.sflag [#allocation4], %s943_s20  ;;  %s708_s4 = scalar_lea.vmem %s970_s23, 128 }
  0x5b   : > { %v182_v9 = vmul.f32 %v178_v6, %v177_v5  ;;  %v183_v10 = vmul.f32 %v179_v7, %v177_v5  ;;  %v184_v12 = vmul.f32 %v180_v8, %v177_v5  ;;  %v185_v13 = vmul.f32 %v181_v11, %v177_v5  ;;  %p709_p4 = scmp.ne.s32.totalorder %s970_s23, %s708_s4  ;;  %s791_s5 = smov [#allocation7]  }
  0x5c   : > { %s712_s6 = sshll.u32 %s791_s5, 4  ;;  %s713_s6 = int_to_ptr.vmem [resolvable:$false] %s712_s6 }
  0x5d   : > { %v575_v14 = vpack.c.bf16 %v183_v10, %v182_v9  ;;  %v578_v15 = vpack.c.bf16 %v185_v13, %v184_v12  ;;  %p710_p6 = pnand %p709_p4, %p898_p12  ;;  %s714_s7 = scalar_lea.vmem %s713_s6, 256 }
  0x5e   : > { %p715_p10 = scmp.lt.s32.totalorder %s970_s23, %s713_s6  ;;  %p716_p13 = scmp.lt.s32.totalorder %s714_s7, %s708_s4 }
  0x5f   : > { %576 = vmatpush3.bf16.msra.mxu0 %v575_v14  ;;  %p711_p8 = pneg %p710_p6 }
  0x60   : > { %577 = vmatprep.subr.bf16.mxu0 %v784_v1  ;;  %p717_p3 = por %p716_p13, %p715_p10 }
  0x62   : > { %p718_p7 = pnand %p717_p3, %p711_p8 }
  0x63   : > { %579 = vmatpush3.bf16.msra.mxu0 %v578_v15 }
  0x66   : > { %562 = vmatmul.mubr.msk.f32.vlgmr.msra.gmra.mrb[0].mxu0 %vm187_vm2, %v186_v16 }
 0x139   : > { %v257_v17 = vpop.f32.mrb[0].mxu0 }
 0x13a   : > { %353 = vrot.lane.b32.xlu1 %v257_v17, %s788_s15  ;;  %266 = vrot.lane.b32.xlu0 %v257_v17, %s789_s17  ;;  %v563_v18 = vpop.f32.mrb[1].mxu0 }
 0x1ac   : > { %v267_v19 = vpop.permute.xlu0 %266  ;;  %v354_v20 = vpop.permute.xlu1 %353 }
 0x1ad   : > { %565 = vmatpush3.xpose.msk.msra.mxu1 %vm268_vm3, %v267_v19 }
 0x1ae   : > { %569 = vmatprep.subr.mxu1 %v786_v3 }
 0x1b0   : > { %567 = vmatmul.mubr.msk.f32.vlgmr.msra.gmra.mrb[0].mxu1 %vm268_vm3, %v257_v17 }
 0x1b1   : > { %570 = vmatpush3.msra.mxu1 %v354_v20  ;;  %571 = vmatprep.mubr.msk.f32.mxu1 %vm785_vm0, %v786_v3 }
 0x283   : > { %v339_v24 = vpop.f32.mrb[0].mxu1 }
 0x284   : > { %v340_v25 = vadd.f32 %v339_v24, %v264_v23  ;;  %v568_v26 = vpop.f32.mrb[1].mxu1 }
 0x286   : > { %v344_v27 = vsel %vm343_vm5, %v340_v25, -inf }
 0x287   : > { %345 = vmax.xlane.f32.xlu0 %v344_v27 }
 0x314   : > { %v346_v28 = vpop.xlane.xlu0 %345 }
 0x315   : > { %v347_v29 = vsub.f32 %v340_v25, %v346_v28 }
 0x317   : > { %v348_v30 = vmul.f32 1.442695, %v347_v29 }
 0x319   : > { %646 = vpow2.f32 %v348_v30 }
 0x323   : > { %v647_v31 = vpop.eup %646 }
 0x324   : > { %572 = vmatmul.mubr.msk.f32.vlgmr.msra.gmra.mrb[2].mxu1 %vm343_vm5, %v647_v31  ;;  %v350_v32 = vsel %vm343_vm5, %v647_v31, 0.0 }
 0x325   : > { %351 = vadd.xlane.f32.xlu1 %v350_v32 }
 0x3b2   : > { %v352_v33 = vpop.xlane.xlu1 %351 }
 0x3b3   : > { %648 = vrcp.f32 %v352_v33 }
 0x3bd   : > { %v649_v34 = vpop.eup %648 }
 0x3f7   : > { %v425_v35 = vpop.f32.mrb[2].mxu1 }
 0x3f8   : > { %v430_v36 = vmul.f32 %v649_v34, %v425_v35  ;;  %v573_v37 = vpop.f32.mrb[3].mxu1 }
 0x3fa   : > { %431 = vst.msk [vmem:[%s173_s22] sm:$0xff] %vm268_vm3, %v430_v36 }
 0x3fb   : > { %721 = shalt.err (!%p718_p7)
}
 0x3fc   : > { %s722_s18 = scalar_lea.hbm %s968_s3, 128  ;;  %s726_s20 = scalar_lea.hbm %s1015_s2, 256 }
 0x3fd   : > { %p723_p9 = scmp.ne.s32.totalorder %s968_s3, %s722_s18  ;;  %p727_p0 = scmp.lt.u32.totalorder %s968_s3, %s1015_s2 }
 0x3fe   : > { %p728_p11 = scmp.lt.u32.totalorder %s726_s20, %s722_s18  ;;  %p730_p4 = scmp.lt.u32.totalorder %s722_s18, %s968_s3 }
 0x3ff   : > { %p724_p2 = pnand %p723_p9, %p898_p12 }
 0x400   : > { %p729_p1 = por %p728_p11, %p727_p0 }
 0x401   : > { %p725_p5 = pneg %p724_p2 }
 0x402   : > { %p731_p6 = por %p730_p4, %p729_p1 }
 0x404   : > { %p732_p8 = pnand %p731_p6, %p725_p5 }
 0x406   : > { %735 = shalt.err (!%p732_p8)
}
 0x407   : > { %586 = dma.vmem_to_hbm [thread:$0]  (%p898_p12), %s970_s23, 128, %s968_s3, %s433_s13  }
 0x408 PF: > { %s458_s29 = sand.u32 1, %s766_s9   ;;  %p1030_p10 = scmp.ne.s32.totalorder %s1020_s16, 0 }
 0x409   : > { %p1031_p13 = scmp.ge.s32.totalorder %s778_s12, 2  ;;  %s459_s15 = scalar_lea.sflag [#allocation4], %s458_s29 }
 0x40b   : > { %p597_p3 = pnand %p1031_p13, %p1030_p10 }
 0x40d   : > { %761 = dma.done.wait (!%p597_p3), %s459_s15, 128  }
 0x40e   : > { %763 = vsyncadd (!%p597_p3), %s459_s15, 4294967168  ;;  %p16_p7 = scmp.ge.s32.totalorder %s863_s21, 4   ;;  %s1032_s9 = smov %s770_s10 }
 0x40f   : > { %s1033_s10 = smov %s774_s11  ;;  %s1034_s11 = smov %s894_s8 }
 0x410   : > { %s1035_s12 = smov %s863_s21  ;;  %18 = sbr.rel (!%p16_p7) target bundleno = 6 (0x6), region = 77 }
 0x417   :  { %464 = vsyncpa [#allocation3], 1 }
 0x418   :  { %466 = vsyncpa [#allocation3 + $0x1], 1 }
 0x419   :  { %467 = vsyncpa [#allocation6], 1 }
 0x41a   :  { %468 = vsyncpa [#allocation4], 1 }
 0x41b   :  { %470 = vsyncpa [#allocation4 + $0x1], 1 }

</bundles_post_ra>
